<compile_context>
chip_gen: v7x
topology: tpu7x:2x2x1
jax: 0.10.0
libtpu: 0.0.40
codegen_flags: <defaults>
</compile_context>

<pallas_src>
import functools

import jax
import jax.numpy as jnp
import numpy as np
from jax import lax
from jax.experimental import pallas as pl
from jax.experimental.pallas import tpu as pltpu

MARGIN = 2.0   # TripletLoss default margin
EPS = 1e-6     # F.pairwise_distance default eps (added to the raw difference)


def _round_up(x, m):
    return ((x + m - 1) // m) * m


def _cdiv(a, b):
    return -(-a // b)


def _triplet_loss_kernel(a_ref, p_ref, n_ref, maxp_ref, minn_ref, *,
                         batch, tiles_per_shard):
    s = pl.program_id(0)   # shard index ("parallel": maps to TensorCores on v7x)
    i = pl.program_id(1)   # batch-tile index within the shard ("arbitrary": reduction)

    # Fresh accumulator block per shard.
    @pl.when(i == 0)
    def _init():
        maxp_ref[...] = jnp.full(maxp_ref.shape, -jnp.inf, maxp_ref.dtype)
        minn_ref[...] = jnp.full(minn_ref.shape, jnp.inf, minn_ref.dtype)

    # Native-dtype DMA; upcast to f32 in-vreg (free VALU filler) before adding EPS.
    a = a_ref[...].astype(jnp.float32)          # (TB, D)
    p = p_ref[...].astype(jnp.float32)
    n = n_ref[...].astype(jnp.float32)
    tb = a.shape[0]

    # Valid-row mask: covers the ragged last tile and phantom (clamped) tiles.
    tile_idx = s * tiles_per_shard + i
    row = lax.broadcasted_iota(jnp.int32, (tb, 1), 0) + tile_idx * tb
    row_valid = row < batch                     # (TB, 1)

    # torch.pairwise_distance: ||x1 - x2 + eps||_2 along the feature dim.
    # sqrt is deferred: track squared distances (monotone transform).
    dpos = a - p + EPS
    dneg = a - n + EPS
    pos2 = jnp.sum(dpos * dpos, axis=1, keepdims=True)   # (TB, 1)
    neg2 = jnp.sum(dneg * dneg, axis=1, keepdims=True)   # (TB, 1)
    pos2 = jnp.where(row_valid, pos2, -jnp.inf)
    neg2 = jnp.where(row_valid, neg2, jnp.inf)

    tile_max = jnp.max(pos2, axis=0, keepdims=True)      # (1, 1)
    tile_min = jnp.min(neg2, axis=0, keepdims=True)      # (1, 1)

    # Running per-shard partials, broadcast into the lane-dense (8, 128) output block.
    maxp_ref[...] = jnp.maximum(maxp_ref[...], tile_max)
    minn_ref[...] = jnp.minimum(minn_ref[...], tile_min)


def triplet_loss(anchor, positive, negative, margin=MARGIN, *, max_tile_rows=4096):
    """Pallas implementation of TripletLoss.forward((anchor, positive, negative), labels)."""
    assert anchor.shape == positive.shape == negative.shape
    B, D = anchor.shape
    itemsize = jnp.dtype(anchor.dtype).itemsize
    sub = max(8, 32 // itemsize)                # sublane granularity (8 f32 / 16 bf16)

    # Size the batch tile from a VMEM budget: 3 inputs x 2 buffers x TB x D x itemsize.
    INPUT_VMEM_BUDGET = 24 << 20
    tb_budget = max(sub, INPUT_VMEM_BUDGET // (3 * 2 * D * itemsize))
    TB = min(tb_budget, max_tile_rows, _round_up(B, sub))
    TB = max(sub, (TB // sub) * sub)

    num_tiles = _cdiv(B, TB)
    num_shards = 2 if num_tiles >= 2 else 1     # v7x: 2 TCs; harmless on v5e/v6e
    tps = _cdiv(num_tiles, num_shards)

    # Full feature dim as the last block dim (no lane padding DMA'd from HBM);
    # phantom tiles of the sharded grid are clamped to the last real tile and fully
    # masked in-kernel via the row mask.
    in_spec = pl.BlockSpec(
        (TB, D), lambda s, i: (jnp.minimum(s * tps + i, num_tiles - 1), 0))
    # Per-shard lane-dense accumulator block (output resident across the reduction axis).
    out_spec = pl.BlockSpec((8, 128), lambda s, i: (s, 0))

    kernel = functools.partial(_triplet_loss_kernel, batch=B, tiles_per_shard=tps)

    maxp2, minn2 = pl.pallas_call(
        kernel,
        out_shape=(jax.ShapeDtypeStruct((num_shards * 8, 128), jnp.float32),
                   jax.ShapeDtypeStruct((num_shards * 8, 128), jnp.float32)),
        grid_spec=pltpu.PrefetchScalarGridSpec(
            num_scalar_prefetch=0,
            grid=(num_shards, tps),
            in_specs=[in_spec, in_spec, in_spec],
            out_specs=[out_spec, out_spec],
        ),
        compiler_params=pltpu.CompilerParams(
            dimension_semantics=("parallel", "arbitrary"),
            vmem_limit_bytes=48 << 20),
    )(anchor, positive, negative)

    # Trivial cross-shard combine + deferred sqrt + relu in plain JAX.
    hardest_pos = jnp.sqrt(jnp.max(maxp2))
    hardest_neg = jnp.sqrt(jnp.min(minn2))
    return jnp.maximum(hardest_pos - hardest_neg + margin, 0.0)


def _reference(anchor, positive, negative, margin=MARGIN):
    """Pure-JAX reference mirroring the PyTorch module."""
    anchor = anchor.astype(jnp.float32)
    positive = positive.astype(jnp.float32)
    negative = negative.astype(jnp.float32)
    d_pos = jnp.sqrt(jnp.sum((anchor - positive + EPS) ** 2, axis=1))
    d_neg = jnp.sqrt(jnp.sum((anchor - negative + EPS) ** 2, axis=1))
    return jnp.maximum(jnp.max(d_pos) - jnp.min(d_neg) + margin, 0.0)


if __name__ == "__main__":
    key = jax.random.PRNGKey(0)

    # Case 1: small shape consistent with the module (single tile, single shard).
    k1, k2, k3, k4, k5, k6 = jax.random.split(key, 6)
    B, D = 8, 32
    anchor = jax.random.normal(k1, (B, D), dtype=jnp.float32)
    positive = jax.random.normal(k2, (B, D), dtype=jnp.float32)
    negative = jax.random.normal(k3, (B, D), dtype=jnp.float32)
    loss = triplet_loss(anchor, positive, negative)
    jax.block_until_ready(loss)
    np.testing.assert_allclose(np.asarray(loss),
                               np.asarray(_reference(anchor, positive, negative)),
                               rtol=1e-5, atol=1e-5)

    # Case 2: exercises the tiled / sharded / ragged path (2 shards, ragged + phantom tile).
    B2, D2 = 40, 64
    a2 = jax.random.normal(k4, (B2, D2), dtype=jnp.float32)
    p2 = jax.random.normal(k5, (B2, D2), dtype=jnp.float32)
    n2 = jax.random.normal(k6, (B2, D2), dtype=jnp.float32)
    loss2 = triplet_loss(a2, p2, n2, max_tile_rows=16)
    jax.block_until_ready(loss2)
    np.testing.assert_allclose(np.asarray(loss2),
                               np.asarray(_reference(a2, p2, n2)),
                               rtol=1e-5, atol=1e-5)

    # Case 3: native bf16 inputs (no wrapper cast; kernel upcasts in-vreg before EPS).
    a3 = a2.astype(jnp.bfloat16)
    p3 = p2.astype(jnp.bfloat16)
    n3 = n2.astype(jnp.bfloat16)
    loss3 = triplet_loss(a3, p3, n3, max_tile_rows=16)
    jax.block_until_ready(loss3)
    np.testing.assert_allclose(np.asarray(loss3),
                               np.asarray(_reference(a3, p3, n3)),
                               rtol=1e-4, atol=1e-4)

    print("KERNEL_OK")
</pallas_src>

<mosaic_0001>
module attributes {stable_mosaic.version = 11 : i64} {
  func.func @_triplet_loss_kernel(%arg0: i32, %arg1: i32, %arg2: memref<8x32xf32, #tpu.memory_space<vmem>>, %arg3: memref<8x32xf32, #tpu.memory_space<vmem>>, %arg4: memref<8x32xf32, #tpu.memory_space<vmem>>, %arg5: memref<8x128xf32, #tpu.memory_space<vmem>>, %arg6: memref<8x128xf32, #tpu.memory_space<vmem>>) attributes {dimension_semantics = [#tpu.dimension_semantics<parallel>, #tpu.dimension_semantics<arbitrary>], iteration_bounds = array<i64: 1, 1>, scalar_prefetch = 0 : i64, scratch_operands = 0 : i64, tpu.core_type = #tpu.core_type<tc>, window_params = [{transform_indices = @transform_0, window_bounds = array<i64: 8, 32>}, {transform_indices = @transform_1, window_bounds = array<i64: 8, 32>}, {transform_indices = @transform_2, window_bounds = array<i64: 8, 32>}, {transform_indices = @transform_3, window_bounds = array<i64: 8, 128>}, {transform_indices = @transform_4, window_bounds = array<i64: 8, 128>}]} {
    %c0_i32 = arith.constant 0 : i32
    %0 = arith.cmpi eq, %arg1, %c0_i32 : i32
    %1 = arith.extui %0 : i1 to i32
    %c0_i32_0 = arith.constant 0 : i32
    %2 = arith.cmpi ne, %1, %c0_i32_0 : i32
    scf.if %2 {
      %cst_22 = arith.constant 0xFF800000 : f32
      %42 = vector.broadcast %cst_22 : f32 to vector<8x128xf32>
      %c0_23 = arith.constant 0 : index
      %c0_24 = arith.constant 0 : index
      %43 = vector.load %arg5[%c0_23, %c0_24] : memref<8x128xf32, #tpu.memory_space<vmem>>, vector<8x128xf32>
      tpu.vector_store %arg5[%c0_23, %c0_24], %42 {strides = array<i32>} : memref<8x128xf32, #tpu.memory_space<vmem>>, vector<8x128xf32>,
      %cst_25 = arith.constant 0x7F800000 : f32
      %44 = vector.broadcast %cst_25 : f32 to vector<8x128xf32>
      %c0_26 = arith.constant 0 : index
      %c0_27 = arith.constant 0 : index
      %45 = vector.load %arg6[%c0_26, %c0_27] : memref<8x128xf32, #tpu.memory_space<vmem>>, vector<8x128xf32>
      tpu.vector_store %arg6[%c0_26, %c0_27], %44 {strides = array<i32>} : memref<8x128xf32, #tpu.memory_space<vmem>>, vector<8x128xf32>,
    } else {
    }
    %c0 = arith.constant 0 : index
    %c0_1 = arith.constant 0 : index
    %3 = vector.load %arg2[%c0, %c0_1] : memref<8x32xf32, #tpu.memory_space<vmem>>, vector<8x32xf32>
    %c0_2 = arith.constant 0 : index
    %c0_3 = arith.constant 0 : index
    %4 = vector.load %arg3[%c0_2, %c0_3] : memref<8x32xf32, #tpu.memory_space<vmem>>, vector<8x32xf32>
    %c0_4 = arith.constant 0 : index
    %c0_5 = arith.constant 0 : index
    %5 = vector.load %arg4[%c0_4, %c0_5] : memref<8x32xf32, #tpu.memory_space<vmem>>, vector<8x32xf32>
    %c1_i32 = arith.constant 1 : i32
    %6 = arith.muli %arg0, %c1_i32 : i32
    %7 = arith.addi %6, %arg1 : i32
    %8 = tpu.iota {dimensions = array<i32: 0>} : vector<8x1xi32>
    %c8_i32 = arith.constant 8 : i32
    %9 = arith.muli %7, %c8_i32 : i32
    %10 = vector.broadcast %9 : i32 to vector<8x1xi32>
    %11 = arith.addi %8, %10 : vector<8x1xi32>
    %c8_i32_6 = arith.constant 8 : i32
    %12 = vector.broadcast %c8_i32_6 : i32 to vector<8x1xi32>
    %13 = arith.cmpi slt, %11, %12 : vector<8x1xi32>
    %14 = arith.subf %3, %4 : vector<8x32xf32>
    %cst = arith.constant 9.99999997E-7 : f32
    %15 = vector.broadcast %cst : f32 to vector<8x32xf32>
    %16 = arith.addf %14, %15 : vector<8x32xf32>
    %17 = arith.subf %3, %5 : vector<8x32xf32>
    %cst_7 = arith.constant 9.99999997E-7 : f32
    %18 = vector.broadcast %cst_7 : f32 to vector<8x32xf32>
    %19 = arith.addf %17, %18 : vector<8x32xf32>
    %20 = arith.mulf %16, %16 : vector<8x32xf32>
    %cst_8 = arith.constant dense<0.000000e+00> : vector<8xf32>
    %21 = vector.multi_reduction <add>, %20, %cst_8 [1] : vector<8x32xf32> to vector<8xf32>
    %22 = vector.shape_cast %21 : vector<8xf32> to vector<8x1xf32>
    %23 = arith.mulf %19, %19 : vector<8x32xf32>
    %cst_9 = arith.constant dense<0.000000e+00> : vector<8xf32>
    %24 = vector.multi_reduction <add>, %23, %cst_9 [1] : vector<8x32xf32> to vector<8xf32>
    %25 = vector.shape_cast %24 : vector<8xf32> to vector<8x1xf32>
    %cst_10 = arith.constant 0xFF800000 : f32
    %26 = vector.broadcast %cst_10 : f32 to vector<8x1xf32>
    %27 = arith.select %13, %22, %26 : vector<8x1xi1>, vector<8x1xf32>
    %cst_11 = arith.constant 0x7F800000 : f32
    %28 = vector.broadcast %cst_11 : f32 to vector<8x1xf32>
    %29 = arith.select %13, %25, %28 : vector<8x1xi1>, vector<8x1xf32>
    %cst_12 = arith.constant dense<0xFF800000> : vector<1xf32>
    %30 = vector.multi_reduction <maximumf>, %27, %cst_12 [0] : vector<8x1xf32> to vector<1xf32>
    %31 = vector.shape_cast %30 : vector<1xf32> to vector<1x1xf32>
    %cst_13 = arith.constant dense<0x7F800000> : vector<1xf32>
    %32 = vector.multi_reduction <minimumf>, %29, %cst_13 [0] : vector<8x1xf32> to vector<1xf32>
    %33 = vector.shape_cast %32 : vector<1xf32> to vector<1x1xf32>
    %c0_14 = arith.constant 0 : index
    %c0_15 = arith.constant 0 : index
    %34 = vector.load %arg5[%c0_14, %c0_15] : memref<8x128xf32, #tpu.memory_space<vmem>>, vector<8x128xf32>
    %35 = vector.broadcast %31 : vector<1x1xf32> to vector<8x128xf32>
    %36 = arith.maximumf %34, %35 : vector<8x128xf32>
    %c0_16 = arith.constant 0 : index
    %c0_17 = arith.constant 0 : index
    %37 = vector.load %arg5[%c0_16, %c0_17] : memref<8x128xf32, #tpu.memory_space<vmem>>, vector<8x128xf32>
    tpu.vector_store %arg5[%c0_16, %c0_17], %36 {strides = array<i32>} : memref<8x128xf32, #tpu.memory_space<vmem>>, vector<8x128xf32>,
    %c0_18 = arith.constant 0 : index
    %c0_19 = arith.constant 0 : index
    %38 = vector.load %arg6[%c0_18, %c0_19] : memref<8x128xf32, #tpu.memory_space<vmem>>, vector<8x128xf32>
    %39 = vector.broadcast %33 : vector<1x1xf32> to vector<8x128xf32>
    %40 = arith.minimumf %38, %39 : vector<8x128xf32>
    %c0_20 = arith.constant 0 : index
    %c0_21 = arith.constant 0 : index
    %41 = vector.load %arg6[%c0_20, %c0_21] : memref<8x128xf32, #tpu.memory_space<vmem>>, vector<8x128xf32>
    tpu.vector_store %arg6[%c0_20, %c0_21], %40 {strides = array<i32>} : memref<8x128xf32, #tpu.memory_space<vmem>>, vector<8x128xf32>,
    return
  }
  func.func @transform_0(%arg0: i32, %arg1: i32) -> (i32, i32) {
    %c1_i32 = arith.constant 1 : i32
    %0 = arith.muli %arg0, %c1_i32 : i32
    %1 = arith.addi %0, %arg1 : i32
    %c0_i32 = arith.constant 0 : i32
    %2 = arith.minsi %1, %c0_i32 : i32
    %c0_i32_0 = arith.constant 0 : i32
    %c0_i32_1 = arith.constant 0 : i32
    return %2, %c0_i32_0 : i32, i32
  }
  func.func @transform_1(%arg0: i32, %arg1: i32) -> (i32, i32) {
    %c1_i32 = arith.constant 1 : i32
    %0 = arith.muli %arg0, %c1_i32 : i32
    %1 = arith.addi %0, %arg1 : i32
    %c0_i32 = arith.constant 0 : i32
    %2 = arith.minsi %1, %c0_i32 : i32
    %c0_i32_0 = arith.constant 0 : i32
    %c0_i32_1 = arith.constant 0 : i32
    return %2, %c0_i32_0 : i32, i32
  }
  func.func @transform_2(%arg0: i32, %arg1: i32) -> (i32, i32) {
    %c1_i32 = arith.constant 1 : i32
    %0 = arith.muli %arg0, %c1_i32 : i32
    %1 = arith.addi %0, %arg1 : i32
    %c0_i32 = arith.constant 0 : i32
    %2 = arith.minsi %1, %c0_i32 : i32
    %c0_i32_0 = arith.constant 0 : i32
    %c0_i32_1 = arith.constant 0 : i32
    return %2, %c0_i32_0 : i32, i32
  }
  func.func @transform_3(%arg0: i32, %arg1: i32) -> (i32, i32) {
    %c0_i32 = arith.constant 0 : i32
    %c0_i32_0 = arith.constant 0 : i32
    return %arg0, %c0_i32 : i32, i32
  }
  func.func @transform_4(%arg0: i32, %arg1: i32) -> (i32, i32) {
    %c0_i32 = arith.constant 0 : i32
    %c0_i32_0 = arith.constant 0 : i32
    return %arg0, %c0_i32 : i32, i32
  }
}

</mosaic_0001>

<bundles_post_ra>
// kernel: tpu_custom_call.1
= control target key start
LH: loop header
LB: loop body
LE: loop exit
PB: predicated region body
PF: predicated region fallthrough
CT: control target
= control target key end

     0   :  { %10 = vsyncpa [#allocation3], 0  ;;  %s377_s0 = inlined_call_operand.hbm [shape: f32[8,32], index: 0, kind: input, shape index: {}]   ;;  %s378_s1 = inlined_call_operand.hbm [shape: f32[8,32], index: 1, kind: input, shape index: {}]   ;;  %s379_s2 = inlined_call_operand.hbm [shape: f32[8,32], index: 2, kind: input, shape index: {}]   ;;  %s380_s3 = inlined_call_operand.hbm [shape: f32[8,128], index: 3, kind: output, shape index: {0}]   ;;  %s381_s4 = inlined_call_operand.hbm [shape: f32[8,128], index: 4, kind: output, shape index: {1}]  }
   0x1   :  { %11 = vsyncpa [#allocation6], 0 }
   0x2   :  { %12 = vsyncpa [#allocation4], 0 }
   0x3   :  { %13 = vsyncpa [#allocation10], 0  ;;  %s287_s15 = smov [#allocation5]   ;;  %s288_s17 = smov [#allocation2]  }
   0x4   :  { %s40_s16 = sshll.u32 %s287_s15, 4  ;;  %s25_s18 = sshll.u32 %s288_s17, 4  ;;  %s41_s16 = int_to_ptr.vmem [resolvable:$true] %s40_s16  ;;  %s26_s18 = int_to_ptr.vmem [resolvable:$true] %s25_s18 }
   0x5   :  { %s169_s21 = scalar_lea.hbm %s378_s1, 128 }
   0x6   :  { %p170_p0 = scmp.ne.s32.totalorder %s378_s1, %s169_s21  ;;  %p173_p1 = scmp.lt.u32.totalorder %s169_s21, %s378_s1 }
   0x8   :  { %p175_p2 = pnand %p173_p1, %p170_p0 }
   0xa   :  { %178 = shalt.err (!%p175_p2)
}
   0xb   :  { %s179_s26 = scalar_lea.vmem %s41_s16, 128  ;;  %p184_p4 = scmp.lt.s32.totalorder %s41_s16, %s41_s16 }
   0xc   :  { %p180_p3 = scmp.ne.s32.totalorder %s41_s16, %s179_s26  ;;  %p185_p5 = scmp.lt.s32.totalorder %s179_s26, %s179_s26 }
   0xe   :  { %p186_p6 = por %p185_p5, %p184_p4 }
  0x10   :  { %p187_p7 = pnand %p186_p6, %p180_p3 }
  0x12   :  { %190 = shalt.err (!%p187_p7)
}
  0x13   :  { %43 = dma.hbm_to_vmem [thread:$0]  %s378_s1, 128, %s41_s16, [#allocation6]  }
  0x14   :  { %s191_s5 = scalar_lea.hbm %s377_s0, 128 }
  0x15   :  { %p192_p8 = scmp.ne.s32.totalorder %s377_s0, %s191_s5  ;;  %p195_p9 = scmp.lt.u32.totalorder %s191_s5, %s377_s0 }
  0x17   :  { %p197_p10 = pnand %p195_p9, %p192_p8 }
  0x19   :  { %200 = shalt.err (!%p197_p10)
}
  0x1a   :  { %s201_s10 = scalar_lea.vmem %s26_s18, 128  ;;  %p206_p12 = scmp.lt.s32.totalorder %s26_s18, %s26_s18 }
  0x1b   :  { %p202_p11 = scmp.ne.s32.totalorder %s26_s18, %s201_s10  ;;  %p207_p13 = scmp.lt.s32.totalorder %s201_s10, %s201_s10 }
  0x1d   :  { %p208_p0 = por %p207_p13, %p206_p12 }
  0x1f   :  { %p209_p1 = pnand %p208_p0, %p202_p11 }
  0x21   :  { %212 = shalt.err (!%p209_p1)
}
  0x22   :  { %28 = dma.hbm_to_vmem [thread:$0]  %s377_s0, 128, %s26_s18, [#allocation3]  }
  0x23   :  { %s289_s12 = smov [#allocation7]   ;;  %s213_s16 = scalar_lea.hbm %s379_s2, 128 }
  0x24   :  { %s55_s13 = sshll.u32 %s289_s12, 4  ;;  %p214_p2 = scmp.ne.s32.totalorder %s379_s2, %s213_s16  ;;  %s56_s13 = int_to_ptr.vmem [resolvable:$true] %s55_s13 }
  0x25   :  { %p217_p3 = scmp.lt.u32.totalorder %s213_s16, %s379_s2 }
  0x27   :  { %p219_p4 = pnand %p217_p3, %p214_p2 }
  0x29   :  { %222 = shalt.err (!%p219_p4)
}
  0x2a   :  { %s223_s22 = scalar_lea.vmem %s56_s13, 128  ;;  %p228_p6 = scmp.lt.s32.totalorder %s56_s13, %s56_s13 }
  0x2b   :  { %p224_p5 = scmp.ne.s32.totalorder %s56_s13, %s223_s22  ;;  %p229_p7 = scmp.lt.s32.totalorder %s223_s22, %s223_s22 }
  0x2d   :  { %p230_p8 = por %p229_p7, %p228_p6 }
  0x2f   :  { %p231_p9 = pnand %p230_p8, %p224_p5 }
  0x31   :  { %234 = shalt.err (!%p231_p9)
}
  0x32   :  { %58 = dma.hbm_to_vmem [thread:$0]  %s379_s2, 128, %s56_s13, [#allocation6]  }
  0x33   :  { %279 = dma.done.wait [#allocation3], 128  }
  0x34   :  { %280 = vsyncadd [#allocation3], 4294967168 }
  0x35   :  { %281 = dma.done.wait [#allocation6], 256  }
  0x36   :  { %282 = vsyncadd [#allocation6], 4294967040  ;;  %v83_v0 = vld [vmem:[#allocation2] sm:$0xff]  ;;  %v84_v1 = vld [vmem:[#allocation5] sm:$0xff]  ;;  %vm98_vm0 = vcmask 261120   ;;  %s290_s2 = smov [#allocation8]  }
  0x37   :  { %v85_v2 = vld [vmem:[#allocation7] sm:$0xff]  ;;  %v93_v3 = vsub.f32 %v83_v0, %v84_v1  ;;  %s132_s23 = sshll.u32 %s290_s2, 4  ;;  %s291_s24 = smov [#allocation9]   ;;  %s133_s23 = int_to_ptr.vmem [resolvable:$true] %s132_s23 }
  0x38   :  { %v95_v4 = vsub.f32 %v83_v0, %v85_v2  ;;  %s142_s25 = sshll.u32 %s291_s24, 4  ;;  %s235_s26 = scalar_lea.vmem %s133_s23, 128  ;;  %s143_s25 = int_to_ptr.vmem [resolvable:$true] %s142_s25 }
  0x39   :  { %v94_v5 = vadd.f32 1e-06, %v93_v3  ;;  %p236_p10 = scmp.ne.s32.totalorder %s133_s23, %s235_s26  ;;  %p240_p11 = scmp.lt.s32.totalorder %s133_s23, %s133_s23 }
  0x3a   :  { %v96_v6 = vadd.f32 1e-06, %v95_v4  ;;  %p241_p12 = scmp.lt.s32.totalorder %s235_s26, %s235_s26 }
  0x3b   :  { %v97_v7 = vmul.f32 %v94_v5, %v94_v5 }
  0x3c   :  { %v102_v8 = vmul.f32 %v96_v6, %v96_v6  ;;  %p242_p13 = por %p241_p12, %p240_p11 }
  0x3d   :  { %v99_v9 = vsel %vm98_vm0, %v97_v7, 0.0 }
  0x3e   :  { %100 = vadd.xlane.f32.xlu0 %v99_v9  ;;  %v103_v10 = vsel %vm98_vm0, %v102_v8, 0.0  ;;  %p243_p0 = pnand %p242_p13, %p236_p10 }
  0x42   :  { %104 = vadd.xlane.f32.xlu0 %v103_v10 }
  0xcb   :  { %v101_v11 = vpop.xlane.xlu0 %100 }
  0xcc   :  { %v108_v12 = vrot.slane %v101_v11, 4 }
  0xce   :  { %v109_v13 = vmax.f32 %v101_v11, %v108_v12 }
  0xcf   :  { %v105_v14 = vpop.xlane.xlu0 %104 }
  0xd0   :  { %v110_v15 = vrot.slane %v109_v13, 2  ;;  %v114_v16 = vrot.slane %v105_v14, 4 }
  0xd2   :  { %v111_v17 = vmax.f32 %v109_v13, %v110_v15  ;;  %v115_v18 = vmin.f32 %v105_v14, %v114_v16 }
  0xd4   :  { %v112_v19 = vrot.slane %v111_v17, 1  ;;  %v116_v20 = vrot.slane %v115_v18, 2 }
  0xd6   :  { %v113_v21 = vmax.f32 %v111_v17, %v112_v19  ;;  %v117_v22 = vmin.f32 %v115_v18, %v116_v20 }
  0xd8   :  { %v118_v23 = vrot.slane %v117_v22, 1  ;;  %122 = vst [vmem:[#allocation8] sm:$0xff] %v113_v21 }
  0xda   :  { %v119_v24 = vmin.f32 %v117_v22, %v118_v23 }
  0xdb   :  { %246 = shalt.err (!%p243_p0)
}
  0xdc   :  { %s247_s29 = scalar_lea.hbm %s380_s3, 128 }
  0xdd   :  { %p248_p1 = scmp.ne.s32.totalorder %s380_s3, %s247_s29  ;;  %p251_p2 = scmp.lt.u32.totalorder %s247_s29, %s380_s3 }
  0xdf   :  { %p253_p3 = pnand %p251_p2, %p248_p1 }
  0xe1   :  { %256 = shalt.err (!%p253_p3)
}
  0xe2   :  { %135 = dma.vmem_to_hbm [thread:$0]  %s133_s23, 128, %s380_s3, [#allocation4]   ;;  %125 = vst [vmem:[#allocation9] sm:$0xff] %v119_v24 }
  0xe3   :  { %s257_s10 = scalar_lea.vmem %s143_s25, 128  ;;  %p262_p5 = scmp.lt.s32.totalorder %s143_s25, %s143_s25 }
  0xe4   :  { %p258_p4 = scmp.ne.s32.totalorder %s143_s25, %s257_s10  ;;  %p263_p6 = scmp.lt.s32.totalorder %s257_s10, %s257_s10 }
  0xe6   :  { %p264_p7 = por %p263_p6, %p262_p5 }
  0xe8   :  { %p265_p8 = pnand %p264_p7, %p258_p4 }
  0xea   :  { %268 = shalt.err (!%p265_p8)
}
  0xeb   :  { %s269_s12 = scalar_lea.hbm %s381_s4, 128 }
  0xec   :  { %p270_p9 = scmp.ne.s32.totalorder %s381_s4, %s269_s12  ;;  %p273_p10 = scmp.lt.u32.totalorder %s269_s12, %s381_s4 }
  0xee   :  { %p275_p11 = pnand %p273_p10, %p270_p9 }
  0xf0   :  { %278 = shalt.err (!%p275_p11)
}
  0xf1   :  { %145 = dma.vmem_to_hbm [thread:$0]  %s143_s25, 128, %s381_s4, [#allocation10]  }
  0xf2   :  { %283 = dma.done.wait [#allocation4], 128  }
  0xf3   :  { %284 = vsyncadd [#allocation4], 4294967168 }
  0xf4   :  { %285 = dma.done.wait [#allocation10], 128  }
  0xf5   :  { %286 = vsyncadd [#allocation10], 4294967168 }
  0xf6   :  { %152 = vsyncpa [#allocation3], 1 }
  0xf7   :  { %153 = vsyncpa [#allocation6], 1 }
  0xf8   :  { %154 = vsyncpa [#allocation4], 1 }
  0xf9   :  { %155 = vsyncpa [#allocation10], 1 }

</bundles_post_ra>
